<compile_context>
chip_gen: v7x
topology: tpu7x:2x2x1
jax: 0.10.0
libtpu: 0.0.40
codegen_flags: <defaults>
</compile_context>

<pallas_src>
import functools

import jax
import jax.numpy as jnp
from jax import lax
from jax.experimental import pallas as pl
from jax.experimental.pallas import tpu as pltpu


def _round_up(x: int, m: int) -> int:
    return (x + m - 1) // m * m


def _rbm_forward_kernel(v_ref, w_ref, hb_ref, vb_ref, vrec_ref, hprob_ref):
    v = v_ref[...]          # [tile_b, Nv_p]  (f32 or bf16)
    w = w_ref[...]          # [Nh_p, Nv_p]    (PyTorch layout, never transposed)

    # h_logits = v @ W.T : contract on Nv (last dim of both operands). The MXU
    # supports the transposed RHS natively — no XLU transpose / W re-layout.
    h_logits = lax.dot_general(
        v, w,
        dimension_numbers=(((1,), (1,)), ((), ())),
        preferred_element_type=jnp.float32,
    ) + hb_ref[...]                                    # [tile_b, Nh_p], f32
    h_prob = jax.nn.sigmoid(h_logits)                  # f32 (EUP/VPU in f32)

    # v_logits = h_prob @ W : contract on Nh.
    v_logits = lax.dot_general(
        h_prob.astype(w.dtype), w,
        dimension_numbers=(((1,), (0,)), ((), ())),
        preferred_element_type=jnp.float32,
    ) + vb_ref[...]                                    # [tile_b, Nv_p], f32
    v_recon = jax.nn.sigmoid(v_logits)

    hprob_ref[...] = h_prob.astype(hprob_ref.dtype)
    vrec_ref[...] = v_recon.astype(vrec_ref.dtype)


def rbm_forward(v, W, h_bias, v_bias, *, tile_b=None, use_bf16=False):
    """Pallas RBM forward. v: [B, Nv], W: [Nh, Nv], h_bias: [Nh], v_bias: [Nv]."""
    B, Nv = v.shape
    Nh, Nv2 = W.shape
    assert Nv == Nv2

    f32 = jnp.float32
    in_dtype = jnp.bfloat16 if use_bf16 else f32
    in_bytes = 2 if use_bf16 else 4

    Nv_p = _round_up(Nv, 128)
    Nh_p = _round_up(Nh, 128)

    # --- generation-aware VMEM budget --------------------------------------
    try:
        vmem_cap = int(getattr(pltpu.get_tpu_info(), "vmem_capacity_bytes",
                               64 << 20))
    except Exception:
        vmem_cap = 64 << 20                # conservative (v7x) fallback
    vmem_ceiling = max(16 << 20, int(0.75 * vmem_cap))

    bytes_w = Nh_p * Nv_p * in_bytes       # single-buffered (pl.Buffered(1))
    bytes_bias = (Nh_p + Nv_p) * 4         # single-buffered

    def _vmem_estimate(tb):
        # Double-buffered v tile + output tiles, plus f32 intermediates.
        io = 2 * tb * (Nv_p * in_bytes + (Nv_p + Nh_p) * 4)
        inter = 2 * tb * (Nv_p + Nh_p) * 4
        return bytes_w + bytes_bias + io + inter

    # --- tile_b selection ----------------------------------------------------
    if tile_b is None:
        tile_b = 256                       # fills the 2x256^2 MXU on v6e/v7x
    tile_b = min(_round_up(tile_b, 8), _round_up(B, 8))
    # Keep >=2 grid tiles when the batch allows, so the "parallel" grid axis
    # can feed both v7x TensorCores instead of collapsing to one step.
    if B > 8 and _round_up(B, tile_b) // tile_b < 2:
        tile_b = _round_up((B + 1) // 2, 8)
    # Shrink until the estimate fits the generation-aware budget.
    while tile_b > 8 and int(1.4 * _vmem_estimate(tile_b)) > vmem_ceiling:
        tile_b = max(8, _round_up(tile_b // 2, 8))

    B_p = _round_up(B, tile_b)
    n_tiles = B_p // tile_b

    vmem_limit = max(16 << 20,
                     min(int(1.4 * _vmem_estimate(tile_b)) + (2 << 20),
                         vmem_ceiling))

    # --- padding (skipped when already aligned; zero padding is exact) ------
    # NOTE: for training loops, pad/cast W and the biases once outside instead
    # of per call.
    if B_p == B and Nv_p == Nv:
        v_p = v.astype(in_dtype)
    else:
        v_p = jnp.zeros((B_p, Nv_p), in_dtype).at[:B, :Nv].set(v.astype(in_dtype))
    if Nh_p == Nh and Nv_p == Nv:
        W_p = W.astype(in_dtype)
    else:
        W_p = jnp.zeros((Nh_p, Nv_p), in_dtype).at[:Nh, :Nv].set(W.astype(in_dtype))
    if Nh_p == Nh:
        hb_p = h_bias.astype(f32).reshape(1, Nh_p)
    else:
        hb_p = jnp.zeros((1, Nh_p), f32).at[0, :Nh].set(h_bias.astype(f32))
    if Nv_p == Nv:
        vb_p = v_bias.astype(f32).reshape(1, Nv_p)
    else:
        vb_p = jnp.zeros((1, Nv_p), f32).at[0, :Nv].set(v_bias.astype(f32))

    out_shapes = (
        jax.ShapeDtypeStruct((B_p, Nv_p), f32),   # v_reconstruct_prob
        jax.ShapeDtypeStruct((B_p, Nh_p), f32),   # h_prob
    )

    grid_spec = pltpu.PrefetchScalarGridSpec(
        num_scalar_prefetch=0,
        grid=(n_tiles,),
        in_specs=[
            pl.BlockSpec((tile_b, Nv_p), lambda i: (i, 0)),            # v tile
            pl.BlockSpec((Nh_p, Nv_p), lambda i: (0, 0),
                         pipeline_mode=pl.Buffered(1)),                # W resident
            pl.BlockSpec((1, Nh_p), lambda i: (0, 0),
                         pipeline_mode=pl.Buffered(1)),                # h_bias
            pl.BlockSpec((1, Nv_p), lambda i: (0, 0),
                         pipeline_mode=pl.Buffered(1)),                # v_bias
        ],
        out_specs=[
            pl.BlockSpec((tile_b, Nv_p), lambda i: (i, 0)),
            pl.BlockSpec((tile_b, Nh_p), lambda i: (i, 0)),
        ],
    )

    cost = pl.CostEstimate(
        flops=2 * 2 * B_p * Nh_p * Nv_p,                      # two matmuls
        transcendentals=B_p * (Nh_p + Nv_p),                  # sigmoid exps
        bytes_accessed=(in_bytes * (B_p * Nv_p + Nh_p * Nv_p)
                        + 4 * (Nh_p + Nv_p)
                        + 4 * (B_p * Nv_p + B_p * Nh_p)),
    )

    vrec_p, hprob_p = pl.pallas_call(
        _rbm_forward_kernel,
        out_shape=out_shapes,
        grid_spec=grid_spec,
        compiler_params=pltpu.CompilerParams(
            dimension_semantics=("parallel",),
            vmem_limit_bytes=vmem_limit,
        ),
        cost_estimate=cost,
    )(v_p, W_p, hb_p, vb_p)

    return vrec_p[:B, :Nv], hprob_p[:B, :Nh]


def rbm_forward_ref(v, W, h_bias, v_bias):
    h_prob = jax.nn.sigmoid(v @ W.T + h_bias)
    v_recon = jax.nn.sigmoid(h_prob @ W + v_bias)
    return v_recon, h_prob


def _run_case(key, B, n_visible, n_hidden, *, init_scale=0.0001,
              use_bf16=False, atol=1e-5, rtol=1e-5):
    k_v, k_w = jax.random.split(key)
    v = jax.random.uniform(k_v, (B, n_visible), dtype=jnp.float32)
    W = init_scale * jax.random.normal(k_w, (n_hidden, n_visible),
                                       dtype=jnp.float32)
    h_bias = jnp.zeros((n_hidden,), dtype=jnp.float32)
    v_bias = jnp.zeros((n_visible,), dtype=jnp.float32)

    fwd = jax.jit(functools.partial(rbm_forward, use_bf16=use_bf16))
    v_recon, h_prob = fwd(v, W, h_bias, v_bias)
    jax.block_until_ready((v_recon, h_prob))

    v_recon_ref, h_prob_ref = rbm_forward_ref(v, W, h_bias, v_bias)
    assert v_recon.shape == (B, n_visible)
    assert h_prob.shape == (B, n_hidden)
    assert jnp.allclose(v_recon, v_recon_ref, atol=atol, rtol=rtol)
    assert jnp.allclose(h_prob, h_prob_ref, atol=atol, rtol=rtol)


if __name__ == "__main__":
    key = jax.random.PRNGKey(0)
    k0, k1, k2 = jax.random.split(key, 3)

    # Unaligned shapes: exercises the padding path (lane-dense stores preserved).
    _run_case(k0, B=32, n_visible=200, n_hidden=96)

    # Aligned shapes: no padding copies; grid keeps >=2 batch tiles for megacore.
    _run_case(k1, B=256, n_visible=256, n_hidden=128)

    # bf16 MXU fast path (f32 accumulation / bias / sigmoid), looser tolerance.
    _run_case(k2, B=256, n_visible=256, n_hidden=128,
              use_bf16=True, atol=2e-2, rtol=2e-2)

    print("KERNEL_OK")
</pallas_src>

<mosaic_0001>
module attributes {stable_mosaic.version = 11 : i64} {
  func.func @_rbm_forward_kernel(%arg0: i32, %arg1: memref<16x256xf32, #tpu.memory_space<vmem>>, %arg2: memref<128x256xf32, #tpu.memory_space<vmem>>, %arg3: memref<1x128xf32, #tpu.memory_space<vmem>>, %arg4: memref<1x256xf32, #tpu.memory_space<vmem>>, %arg5: memref<16x256xf32, #tpu.memory_space<vmem>>, %arg6: memref<16x128xf32, #tpu.memory_space<vmem>>) attributes {dimension_semantics = [#tpu.dimension_semantics<parallel>], iteration_bounds = array<i64: 2>, scalar_prefetch = 0 : i64, scratch_operands = 0 : i64, tpu.core_type = #tpu.core_type<tc>, window_params = [{transform_indices = @transform_0, window_bounds = array<i64: 16, 256>}, {pipeline_mode = #tpu.pipeline_mode<synchronous>, transform_indices = @transform_1, window_bounds = array<i64: 128, 256>}, {pipeline_mode = #tpu.pipeline_mode<synchronous>, transform_indices = @transform_2, window_bounds = array<i64: 1, 128>}, {pipeline_mode = #tpu.pipeline_mode<synchronous>, transform_indices = @transform_3, window_bounds = array<i64: 1, 256>}, {transform_indices = @transform_4, window_bounds = array<i64: 16, 256>}, {transform_indices = @transform_5, window_bounds = array<i64: 16, 128>}]} {
    %c0 = arith.constant 0 : index
    %c0_0 = arith.constant 0 : index
    %0 = vector.load %arg1[%c0, %c0_0] : memref<16x256xf32, #tpu.memory_space<vmem>>, vector<16x256xf32>
    %c0_1 = arith.constant 0 : index
    %c0_2 = arith.constant 0 : index
    %1 = vector.load %arg2[%c0_1, %c0_2] : memref<128x256xf32, #tpu.memory_space<vmem>>, vector<128x256xf32>
    %cst = arith.constant dense<0.000000e+00> : vector<16x128xf32>
    %2 = tpu.matmul %0, %1, %cst {dimension_numbers = #tpu.dot_dimension_numbers<[1], [1], [0], [0], [0, 0, 1, 0], [], []>} : vector<16x256xf32>, vector<128x256xf32>, vector<16x128xf32> -> vector<16x128xf32>
    %c0_3 = arith.constant 0 : index
    %c0_4 = arith.constant 0 : index
    %3 = vector.load %arg3[%c0_3, %c0_4] : memref<1x128xf32, #tpu.memory_space<vmem>>, vector<1x128xf32>
    %4 = vector.broadcast %3 : vector<1x128xf32> to vector<16x128xf32>
    %5 = arith.addf %2, %4 : vector<16x128xf32>
    %6 = arith.negf %5 : vector<16x128xf32>
    %7 = math.exp %6 : vector<16x128xf32>
    %cst_5 = arith.constant 1.000000e+00 : f32
    %8 = vector.broadcast %cst_5 : f32 to vector<16x128xf32>
    %9 = arith.addf %8, %7 : vector<16x128xf32>
    %10 = arith.divf %8, %9 : vector<16x128xf32>
    %cst_6 = arith.constant dense<0.000000e+00> : vector<16x256xf32>
    %11 = tpu.matmul %10, %1, %cst_6 {dimension_numbers = #tpu.dot_dimension_numbers<[1], [0], [0], [1], [0, 0, 1, 1], [], []>} : vector<16x128xf32>, vector<128x256xf32>, vector<16x256xf32> -> vector<16x256xf32>
    %c0_7 = arith.constant 0 : index
    %c0_8 = arith.constant 0 : index
    %12 = vector.load %arg4[%c0_7, %c0_8] : memref<1x256xf32, #tpu.memory_space<vmem>>, vector<1x256xf32>
    %13 = vector.broadcast %12 : vector<1x256xf32> to vector<16x256xf32>
    %14 = arith.addf %11, %13 : vector<16x256xf32>
    %15 = arith.negf %14 : vector<16x256xf32>
    %16 = math.exp %15 : vector<16x256xf32>
    %cst_9 = arith.constant 1.000000e+00 : f32
    %17 = vector.broadcast %cst_9 : f32 to vector<16x256xf32>
    %18 = arith.addf %17, %16 : vector<16x256xf32>
    %19 = arith.divf %17, %18 : vector<16x256xf32>
    %c0_10 = arith.constant 0 : index
    %c0_11 = arith.constant 0 : index
    %20 = vector.load %arg6[%c0_10, %c0_11] : memref<16x128xf32, #tpu.memory_space<vmem>>, vector<16x128xf32>
    tpu.vector_store %arg6[%c0_10, %c0_11], %10 {strides = array<i32>} : memref<16x128xf32, #tpu.memory_space<vmem>>, vector<16x128xf32>,
    %c0_12 = arith.constant 0 : index
    %c0_13 = arith.constant 0 : index
    %21 = vector.load %arg5[%c0_12, %c0_13] : memref<16x256xf32, #tpu.memory_space<vmem>>, vector<16x256xf32>
    tpu.vector_store %arg5[%c0_12, %c0_13], %19 {strides = array<i32>} : memref<16x256xf32, #tpu.memory_space<vmem>>, vector<16x256xf32>,
    return
  }
  func.func @transform_0(%arg0: i32) -> (i32, i32) {
    %c0_i32 = arith.constant 0 : i32
    %c0_i32_0 = arith.constant 0 : i32
    return %arg0, %c0_i32 : i32, i32
  }
  func.func @transform_1(%arg0: i32) -> (i32, i32) {
    %c0_i32 = arith.constant 0 : i32
    %c0_i32_0 = arith.constant 0 : i32
    %c0_i32_1 = arith.constant 0 : i32
    return %c0_i32, %c0_i32_0 : i32, i32
  }
  func.func @transform_2(%arg0: i32) -> (i32, i32) {
    %c0_i32 = arith.constant 0 : i32
    %c0_i32_0 = arith.constant 0 : i32
    %c0_i32_1 = arith.constant 0 : i32
    return %c0_i32, %c0_i32_0 : i32, i32
  }
  func.func @transform_3(%arg0: i32) -> (i32, i32) {
    %c0_i32 = arith.constant 0 : i32
    %c0_i32_0 = arith.constant 0 : i32
    %c0_i32_1 = arith.constant 0 : i32
    return %c0_i32, %c0_i32_0 : i32, i32
  }
  func.func @transform_4(%arg0: i32) -> (i32, i32) {
    %c0_i32 = arith.constant 0 : i32
    %c0_i32_0 = arith.constant 0 : i32
    return %arg0, %c0_i32 : i32, i32
  }
  func.func @transform_5(%arg0: i32) -> (i32, i32) {
    %c0_i32 = arith.constant 0 : i32
    %c0_i32_0 = arith.constant 0 : i32
    return %arg0, %c0_i32 : i32, i32
  }
}

</mosaic_0001>

<bundles_post_ra>
// kernel: rbm_forward.1
= control target key start
LH: loop header
LB: loop body
LE: loop exit
PB: predicated region body
PF: predicated region fallthrough
CT: control target
= control target key end

     0   :  { %11 = vsyncpa [#allocation3], 0  ;;  %s1165_s0 = inlined_call_operand.vmem [shape: f32[32,256], index: 0, kind: input, shape index: {}]   ;;  %s1166_s1 = inlined_call_operand.vmem [shape: f32[128,256], index: 1, kind: input, shape index: {}]   ;;  %s1167_s2 = inlined_call_operand.vmem [shape: f32[1,128], index: 2, kind: input, shape index: {}]   ;;  %s1168_s3 = inlined_call_operand.vmem [shape: f32[1,256], index: 3, kind: input, shape index: {}]   ;;  %s1169_s4 = inlined_call_operand.hbm [shape: f32[32,256], index: 4, kind: output, shape index: {0}]   ;;  %s1170_s5 = inlined_call_operand.hbm [shape: f32[32,128], index: 5, kind: output, shape index: {1}]  }
   0x1   :  { %13 = vsyncpa [#allocation3 + $0x1], 0 }
   0x2   :  { %14 = vsyncpa [#allocation5], 0 }
   0x3   :  { %16 = vsyncpa [#allocation5 + $0x1], 0  ;;  %s919_s18 = smov 0   ;;  %s921_s19 = smov 0  }
   0x4   :  { %s923_s20 = smov 0   ;;  %s925_s21 = smov 0  }
   0x5 LB: > { %s940_s22 = sadd.s32 4294967295, %s880_s21   ;;  %s620_s23 = sadd.s32 4294967294, %s880_s21   ;;  %s880_s21 = sphi %s925_s21, %s1176_s21   ;;  %s876_s20 = sphi %s923_s20, %s1175_s20   ;;  %s872_s19 = sphi %s921_s19, %s1174_s19   ;;  %s868_s18 = sphi %s919_s18, %s1173_s18  }
   0x6   : > { %s944_s24 = sadd.s32 1, %s880_s21   ;;  %s118_s25 = sadd.s32 1, %s876_s20 }
   0x7   : > { %s115_s26 = ssub.s32 %s880_s21, %s944_s24  ;;  %p128_p0 = scmp.ne.s32.totalorder %s876_s20, %s872_s19 }
   0x8   : > { %p116_p1 = scmp.eq.s32.totalorder %s115_s26, 0  ;;  %p129_p2 = scmp.eq.s32.totalorder %s940_s22, 1 }
   0x9   : > { %p134_p3 = scmp.ne.s32.totalorder %s872_s19, %s868_s18  ;;  %p135_p4 = scmp.eq.s32.totalorder %s620_s23, 1 }
   0xa   : > { %s955_s27 = scalar_select %p116_p1, %s876_s20, %s118_s25  }
   0xb   : > { %p957_p5 = por %p129_p2, %p128_p0  ;;  %p961_p6 = por %p135_p4, %p134_p3 }
   0xc   : > { %p623_p7 = scmp.ge.s32.totalorder %s880_s21, 1  ;;  %p198_p8 = scmp.lt.s32.totalorder %s880_s21, 3 }
   0xe   : > { %p199_p9 = pnand %p623_p7, %p198_p8 }
   0xf   : > { %v246_v0 = vld [vmem:[%s1166_s1 + $0x8] sm:$0xff] (!%p199_p9)  ;;  %v248_v1 = vld [vmem:[%s1166_s1 + $0x18] sm:$0xff] (!%p199_p9)  ;;  %v245_v2 = vld [vmem:[%s1166_s1] sm:$0xff] (!%p199_p9)  ;;  %s626_s11 = sshll.u32 (!%p199_p9), %s940_s22, 1  ;;  %v882_v52 = vmov (!%p199_p9), 0.0   ;;  %s648_s17 = sshll.u32 (!%p199_p9), %s940_s22, 8 }
  0x10   : > { %202 = sbr.rel (%p199_p9) target bundleno = 582 (0x246), region = 36  ;;  %v649_v3 = vpack.c.bf16 (!%p199_p9), %v248_v1, %v246_v0  ;;  %v247_v4 = vld [vmem:[%s1166_s1 + $0x10] sm:$0xff] (!%p199_p9)  ;;  %v250_v5 = vld [vmem:[%s1166_s1 + $0x28] sm:$0xff] (!%p199_p9)  ;;  %v252_v6 = vld [vmem:[%s1166_s1 + $0x38] sm:$0xff] (!%p199_p9)  ;;  %p233_p10 = scmp.lt.s32.totalorder (!%p199_p9), %s626_s11, 3  ;;  %447 = vmatprep.mubr.f32.mxu1 (!%p199_p9), %v882_v52 }
  0x11   : > { %v651_v7 = vpack.c.bf16 (!%p199_p9), %v247_v4, %v245_v2  ;;  %v653_v8 = vpack.c.bf16 (!%p199_p9), %v252_v6, %v250_v5  ;;  %v249_v9 = vld [vmem:[%s1166_s1 + $0x20] sm:$0xff] (!%p199_p9)  ;;  %v251_v10 = vld [vmem:[%s1166_s1 + $0x30] sm:$0xff] (!%p199_p9)  ;;  %v254_v11 = vld [vmem:[%s1166_s1 + $0x48] sm:$0xff] (!%p199_p9)  ;;  %s1084_s30 = scalar_lea.hbm (!%p199_p9), %s1170_s5, %s648_s17  ;;  %s883_s8 = smov (!%p199_p9), [#allocation4]  }
  0x12   : > { %650 = vmatprep.subr.bf16.mxu0 (!%p199_p9), %v649_v3  ;;  %682 = vmatprep.subr.bf16.mxu1 (!%p199_p9), %v649_v3  ;;  %v256_v12 = vld [vmem:[%s1166_s1 + $0x58] sm:$0xff] (!%p199_p9)  ;;  %v655_v13 = vpack.c.bf16 (!%p199_p9), %v251_v10, %v249_v9  ;;  %v253_v15 = vld [vmem:[%s1166_s1 + $0x40] sm:$0xff] (!%p199_p9)  ;;  %v255_v16 = vld [vmem:[%s1166_s1 + $0x50] sm:$0xff] (!%p199_p9)  ;;  %s790_s9 = sshll.u32 (!%p199_p9), %s883_s8, 4  ;;  %s791_s9 = int_to_ptr.vmem [resolvable:$false] %s790_s9 }
  0x13   : > { %652 = vmatpush1.bf16.xpose.msra.mxu0 (!%p199_p9), %v651_v7  ;;  %684 = vmatpush1.bf16.msra.mxu1 (!%p199_p9), %v651_v7  ;;  %v657_v14 = vpack.c.bf16 (!%p199_p9), %v256_v12, %v254_v11  ;;  %v258_v17 = vld [vmem:[%s1166_s1 + $0x68] sm:$0xff] (!%p199_p9)  ;;  %v260_v18 = vld [vmem:[%s1166_s1 + $0x78] sm:$0xff] (!%p199_p9)  ;;  %v659_v19 = vpack.c.bf16 (!%p199_p9), %v255_v16, %v253_v15  ;;  %v257_v22 = vld [vmem:[%s1166_s1 + $0x60] sm:$0xff] (!%p199_p9) }
  0x14   : > { %654 = vmatprep.subr.bf16.mxu0 (!%p199_p9), %v653_v8  ;;  %686 = vmatprep.subr.bf16.mxu1 (!%p199_p9), %v653_v8  ;;  %v661_v21 = vpack.c.bf16 (!%p199_p9), %v260_v18, %v258_v17  ;;  %v259_v23 = vld [vmem:[%s1166_s1 + $0x70] sm:$0xff] (!%p199_p9)  ;;  %v262_v24 = vld [vmem:[%s1166_s1 + $0x88] sm:$0xff] (!%p199_p9)  ;;  %v264_v25 = vld [vmem:[%s1166_s1 + $0x98] sm:$0xff] (!%p199_p9) }
  0x15   : > { %v663_v26 = vpack.c.bf16 (!%p199_p9), %v259_v23, %v257_v22  ;;  %v665_v27 = vpack.c.bf16 (!%p199_p9), %v264_v25, %v262_v24  ;;  %v261_v28 = vld [vmem:[%s1166_s1 + $0x80] sm:$0xff] (!%p199_p9)  ;;  %v263_v29 = vld [vmem:[%s1166_s1 + $0x90] sm:$0xff] (!%p199_p9)  ;;  %v266_v30 = vld [vmem:[%s1166_s1 + $0xa8] sm:$0xff] (!%p199_p9) }
  0x16   : > { %v268_v31 = vld [vmem:[%s1166_s1 + $0xb8] sm:$0xff] (!%p199_p9)  ;;  %v667_v32 = vpack.c.bf16 (!%p199_p9), %v263_v29, %v261_v28  ;;  %v265_v34 = vld [vmem:[%s1166_s1 + $0xa0] sm:$0xff] (!%p199_p9)  ;;  %v267_v35 = vld [vmem:[%s1166_s1 + $0xb0] sm:$0xff] (!%p199_p9) }
  0x17   : > { %s1178_s11 = smov (!%p233_p10, %s626_s11), 3  ;;  %688 = vmatpush1.bf16.msra.mxu1 %v655_v13  ;;  %v669_v33 = vpack.c.bf16 %v268_v31, %v266_v30  ;;  %v270_v36 = vld [vmem:[%s1166_s1 + $0xc8] sm:$0xff]  ;;  %v272_v37 = vld [vmem:[%s1166_s1 + $0xd8] sm:$0xff]  ;;  %v671_v38 = vpack.c.bf16 %v267_v35, %v265_v34  ;;  %v269_v40 = vld [vmem:[%s1166_s1 + $0xc0] sm:$0xff] }
  0x18   : > { %s645_s10 = sshll.u32 %s1178_s11, 4  ;;  %690 = vmatprep.subr.bf16.mxu1 %v657_v14  ;;  %v673_v39 = vpack.c.bf16 %v272_v37, %v270_v36  ;;  %v271_v41 = vld [vmem:[%s1166_s1 + $0xd0] sm:$0xff]  ;;  %v274_v42 = vld [vmem:[%s1166_s1 + $0xe8] sm:$0xff]  ;;  %v276_v43 = vld [vmem:[%s1166_s1 + $0xf8] sm:$0xff] }
  0x19   : > { %s1007_s23 = scalar_lea.vmem %s1165_s0, %s645_s10  ;;  %v675_v44 = vpack.c.bf16 %v271_v41, %v269_v40  ;;  %v677_v45 = vpack.c.bf16 %v276_v43, %v274_v42  ;;  %v273_v46 = vld [vmem:[%s1166_s1 + $0xe0] sm:$0xff]  ;;  %v275_v47 = vld [vmem:[%s1166_s1 + $0xf0] sm:$0xff]  ;;  %s792_s10 = scalar_lea.vmem %s791_s9, 512 }
  0x1a   : > { %v242_v20 = vld [vmem:[%s1007_s23 + $0x8] sm:$0xff]  ;;  %v679_v48 = vpack.c.bf16 %v275_v47, %v273_v46  ;;  %v241_v49 = vld [vmem:[%s1007_s23] sm:$0xff]  ;;  %v244_v50 = vld [vmem:[%s1007_s23 + $0x18] sm:$0xff] }
  0x1b   : > { %348 = vmatprep.mubr.f32.mxu0 %v242_v20  ;;  %656 = vmatpush1.bf16.xpose.msra.mxu0 %v655_v13  ;;  %v243_v51 = vld [vmem:[%s1007_s23 + $0x10] sm:$0xff]  ;;  %v629_v53 = vld [vmem:[%s1167_s2] ss:$0 sm:$0xff]  ;;  %s1077_s23 = sand.u32 1, %s872_s19  }
  0x1c   : > { %692 = vmatpush1.bf16.msra.mxu1 %v659_v19  ;;  %658 = vmatprep.subr.bf16.mxu0 %v657_v14  ;;  %s625_s15 = sshll.u32 %s1077_s23, 4  ;;  %s496_s6 = scalar_lea.sflag [#allocation5], %s1077_s23 }
  0x1d   : > { %694 = vmatprep.subr.bf16.mxu1 %v661_v21  ;;  %s231_s16 = scalar_lea.vmem [#allocation4], %s625_s15 }
  0x1e   : > { %s526_s25 = sshll.u32 %s231_s16, 4  ;;  %s1086_s25 = int_to_ptr.vmem [resolvable:$true] %s526_s25 }
  0x1f   : > { %s786_s7 = scalar_lea.vmem %s1086_s25, 256  ;;  %p793_p0 = scmp.lt.s32.totalorder %s1086_s25, %s791_s9 }
  0x20   : > { %696 = vmatpush1.bf16.msra.mxu1 %v663_v26  ;;  %p787_p11 = scmp.ne.s32.totalorder %s1086_s25, %s786_s7  ;;  %p794_p1 = scmp.lt.s32.totalorder %s792_s10, %s786_s7 }
  0x21   : > { %698 = vmatprep.subr.bf16.mxu1 %v665_v27 }
  0x22   : > { %p788_p12 = pnand %p787_p11, %p957_p5  ;;  %p795_p2 = por %p794_p1, %p793_p0 }
  0x23   : > { %660 = vmatpush1.bf16.xpose.msra.mxu0 %v659_v19 }
  0x24   : > { %700 = vmatpush1.bf16.msra.mxu1 %v667_v32  ;;  %662 = vmatprep.subr.bf16.mxu0 %v661_v21  ;;  %p789_p13 = pneg %p788_p12 }
  0x25   : > { %702 = vmatprep.subr.bf16.mxu1 %v669_v33 }
  0x26   : > { %p796_p3 = pnand %p795_p2, %p789_p13 }
  0x28   : > { %704 = vmatpush1.bf16.msra.mxu1 %v671_v38 }
  0x29   : > { %706 = vmatprep.subr.bf16.mxu1 %v673_v39 }
  0x2b   : > { %664 = vmatpush1.bf16.xpose.msra.mxu0 %v663_v26 }
  0x2c   : > { %708 = vmatpush1.bf16.msra.mxu1 %v675_v44  ;;  %666 = vmatprep.subr.bf16.mxu0 %v665_v27 }
  0x2d   : > { %710 = vmatprep.subr.bf16.mxu1 %v677_v45 }
  0x30   : > { %712 = vmatpush1.bf16.msra.mxu1 %v679_v48 }
  0x33   : > { %668 = vmatpush1.bf16.xpose.msra.mxu0 %v667_v32 }
  0x34   : > { %670 = vmatprep.subr.bf16.mxu0 %v669_v33 }
  0x3b   : > { %672 = vmatpush1.bf16.xpose.msra.mxu0 %v671_v38 }
  0x3c   : > { %674 = vmatprep.subr.bf16.mxu0 %v673_v39 }
  0x43   : > { %676 = vmatpush1.bf16.xpose.msra.mxu0 %v675_v44 }
  0x44   : > { %678 = vmatprep.subr.bf16.mxu0 %v677_v45 }
  0x4b   : > { %680 = vmatpush1.bf16.xpose.msra.mxu0 %v679_v48 }
  0x52   : > { %349 = vmatmul.mubr.f32.vlgmr.msra.gmra.mrb[0].mxu0 %v241_v49 }
  0x53   : > { %353 = vmatprep.mubr.f32.mxu0 %v244_v50 }
  0x56   : > { %354 = vmatmul.mubr.f32.gmra.mrb[2].mxu0 %v243_v51 }
 0x125   : > { %v350_v54 = vpop.f32.mrb[0].mxu0 }
 0x126   : > { %v351_v55 = vadd.f32 %v629_v53, %v350_v54  ;;  %v352_v56 = vpop.f32.mrb[1].mxu0 }
 0x128   : > { %v630_v57 = vmul.f32 -1.442695, %v351_v55 }
 0x129   : > { %v355_v58 = vpop.f32.mrb[2].mxu0 }
 0x12a   : > { %762 = vpow2.f32 %v630_v57  ;;  %v356_v59 = vadd.f32 %v629_v53, %v355_v58  ;;  %v357_v60 = vpop.f32.mrb[3].mxu0 }
 0x12c   : > { %v631_v61 = vmul.f32 -1.442695, %v356_v59 }
 0x12e   : > { %764 = vpow2.f32 %v631_v61 }
 0x134   : > { %v763_v62 = vpop.eup %762 }
 0x135   : > { %v365_v63 = vadd.f32 1.0, %v763_v62 }
 0x137   : > { %766 = vrcp.f32 %v365_v63 }
 0x138   : > { %v765_v0 = vpop.eup %764 }
 0x139   : > { %v366_v1 = vadd.f32 1.0, %v765_v0 }
 0x13b   : > { %768 = vrcp.f32 %v366_v1 }
 0x141   : > { %v767_v2 = vpop.eup %766 }
 0x142   : > { %448 = vmatmul.mubr.f32.vlgmr.msra.gmra.mrb[0].mxu1 %v767_v2  ;;  %484 = vst [vmem:[%s231_s16] sm:$0xff] %v767_v2 }
 0x143   : > { %453 = vmatprep.mubr.f32.mxu1 %v882_v52 }
 0x145   : > { %v769_v3 = vpop.eup %768 }
 0x146   : > { %454 = vmatmul.mubr.f32.gmra.mrb[2].mxu1 %v769_v3  ;;  %485 = vst [vmem:[%s231_s16 + $0x8] sm:$0xff] %v769_v3 }
 0x147   : > { %799 = shalt.err (!%p796_p3)
}
 0x148   : > { %s800_s12 = scalar_lea.hbm %s1084_s30, 256  ;;  %s804_s15 = scalar_lea.hbm %s1170_s5, 512 }
 0x149   : > { %p801_p4 = scmp.ne.s32.totalorder %s1084_s30, %s800_s12  ;;  %p805_p9 = scmp.lt.u32.totalorder %s1084_s30, %s1170_s5 }
 0x14a   : > { %p806_p10 = scmp.lt.u32.totalorder %s804_s15, %s800_s12  ;;  %p808_p12 = scmp.lt.u32.totalorder %s800_s12, %s1084_s30 }
 0x14b   : > { %p802_p7 = pnand %p801_p4, %p957_p5 }
 0x14c   : > { %p807_p11 = por %p806_p10, %p805_p9 }
 0x14d   : > { %p803_p8 = pneg %p802_p7 }
 0x14e   : > { %p809_p13 = por %p808_p12, %p807_p11 }
 0x150   : > { %p810_p0 = pnand %p809_p13, %p803_p8 }
 0x152   : > { %813 = shalt.err (!%p810_p0)
}
 0x153   : > { %s884_s26 = smov 128   ;;  %s885_s11 = smov 8   ;;  %v373_v4 = vlaneseq  ;;  %v371_v7 = vld [vmem:[%s1168_s3] sm:$0x3] }
 0x154   : > { %714 = dma.vmem_to_hbm [thread:$0]  (%p957_p5), %s1086_s25, 256, %s1084_s30, %s496_s6, %s884_s26, %s884_s26, %s885_s11  }
 0x155   : > { %v374_v5 = vshrl.u32 %v373_v4, 7  ;;  %s624_s25 = sshll.u32 %s1077_s23, 5  ;;  %s647_s30 = sshll.u32 %s940_s22, 9 }
 0x156   : > { %s224_s6 = scalar_lea.vmem [#allocation2], %s624_s25  ;;  %s1120_s13 = scalar_lea.hbm %s1169_s4, %s647_s30 }
 0x157   : > { %v375_v6 = vsub.s32 0, %v374_v5  ;;  %v379_v8 = vsub.s32 1, %v374_v5  ;;  %s510_s9 = sshll.u32 %s224_s6, 4  ;;  %s491_s22 = scalar_lea.sflag [#allocation3], %s1077_s23  ;;  %s1122_s9 = int_to_ptr.vmem [resolvable:$true] %s510_s9 }
 0x158   : > { %s814_s14 = scalar_lea.vmem %s1122_s9, 512  ;;  %s886_s15 = smov [#allocation2]  }
 0x159   : > { %v376_v9 = vrot.slane %v371_v7, %v375_v6  ;;  %v380_v10 = vrot.slane %v371_v7, %v379_v8  ;;  %p815_p1 = scmp.ne.s32.totalorder %s1122_s9, %s814_s14  ;;  %s818_s16 = sshll.u32 %s886_s15, 4  ;;  %s819_s16 = int_to_ptr.vmem [resolvable:$false] %s818_s16 }
 0x15a   : > { %s820_s17 = scalar_lea.vmem %s819_s16, 1024  ;;  %p821_p4 = scmp.lt.s32.totalorder %s1122_s9, %s819_s16 }
 0x15b   : > { %p816_p2 = pnand %p815_p1, %p957_p5  ;;  %p822_p7 = scmp.lt.s32.totalorder %s820_s17, %s814_s14 }
 0x15d   : > { %p817_p3 = pneg %p816_p2  ;;  %p823_p8 = por %p822_p7, %p821_p4 }
 0x15f   : > { %p824_p9 = pnand %p823_p8, %p817_p3 }
 0x215   : > { %v449_v11 = vpop.f32.mrb[0].mxu1 }
 0x216   : > { %v450_v12 = vadd.f32 %v449_v11, %v376_v9  ;;  %v451_v13 = vpop.f32.mrb[1].mxu1 }
 0x217   : > { %v452_v14 = vadd.f32 %v451_v13, %v380_v10 }
 0x218   : > { %v632_v15 = vmul.f32 -1.442695, %v450_v12 }
 0x219   : > { %v633_v16 = vmul.f32 -1.442695, %v452_v14  ;;  %v455_v17 = vpop.f32.mrb[2].mxu1 }
 0x21a   : > { %770 = vpow2.f32 %v632_v15  ;;  %v456_v18 = vadd.f32 %v455_v17, %v376_v9  ;;  %v457_v19 = vpop.f32.mrb[3].mxu1 }
 0x21b   : > { %772 = vpow2.f32 %v633_v16  ;;  %v458_v20 = vadd.f32 %v457_v19, %v380_v10 }
 0x21c   : > { %v634_v21 = vmul.f32 -1.442695, %v456_v18 }
 0x21d   : > { %v635_v22 = vmul.f32 -1.442695, %v458_v20 }
 0x21e   : > { %774 = vpow2.f32 %v634_v21 }
 0x21f   : > { %776 = vpow2.f32 %v635_v22 }
 0x224   : > { %v771_v23 = vpop.eup %770 }
 0x225   : > { %v773_v24 = vpop.eup %772  ;;  %v472_v25 = vadd.f32 1.0, %v771_v23 }
 0x226   : > { %v473_v26 = vadd.f32 1.0, %v773_v24 }
 0x227   : > { %778 = vrcp.f32 %v472_v25 }
 0x228   : > { %v775_v27 = vpop.eup %774  ;;  %780 = vrcp.f32 %v473_v26 }
 0x229   : > { %v777_v28 = vpop.eup %776  ;;  %v474_v29 = vadd.f32 1.0, %v775_v27 }
 0x22a   : > { %v475_v30 = vadd.f32 1.0, %v777_v28 }
 0x22b   : > { %782 = vrcp.f32 %v474_v29 }
 0x22c   : > { %784 = vrcp.f32 %v475_v30 }
 0x231   : > { %v779_v31 = vpop.eup %778 }
 0x232   : > { %v781_v32 = vpop.eup %780  ;;  %486 = vst [vmem:[%s224_s6] sm:$0xff] %v779_v31 }
 0x233   : > { %487 = vst [vmem:[%s224_s6 + $0x8] sm:$0xff] %v781_v32 }
 0x235   : > { %v783_v33 = vpop.eup %782 }
 0x236   : > { %v785_v34 = vpop.eup %784  ;;  %488 = vst [vmem:[%s224_s6 + $0x10] sm:$0xff] %v783_v33 }
 0x237   : > { %489 = vst [vmem:[%s224_s6 + $0x18] sm:$0xff] %v785_v34 }
 0x238   : > { %827 = shalt.err (!%p824_p9)
}
 0x239   : > { %s828_s26 = scalar_lea.hbm %s1120_s13, 512  ;;  %s832_s8 = scalar_lea.hbm %s1169_s4, 1024 }
 0x23a   : > { %p829_p10 = scmp.ne.s32.totalorder %s1120_s13, %s828_s26  ;;  %p833_p13 = scmp.lt.u32.totalorder %s1120_s13, %s1169_s4 }
 0x23b   : > { %p834_p0 = scmp.lt.u32.totalorder %s832_s8, %s828_s26  ;;  %p836_p2 = scmp.lt.u32.totalorder %s828_s26, %s1120_s13 }
 0x23c   : > { %p830_p11 = pnand %p829_p10, %p957_p5 }
 0x23d   : > { %p835_p1 = por %p834_p0, %p833_p13 }
 0x23e   : > { %p831_p12 = pneg %p830_p11 }
 0x23f   : > { %p837_p3 = por %p836_p2, %p835_p1 }
 0x241   : > { %p838_p4 = pnand %p837_p3, %p831_p12 }
 0x243   : > { %841 = shalt.err (!%p838_p4)
}
 0x244   : > { %s887_s6 = smov 256   ;;  %s888_s10 = smov 16  }
 0x245   : > { %713 = dma.vmem_to_hbm [thread:$0]  (%p957_p5), %s1122_s9, 512, %s1120_s13, %s491_s22, %s887_s6, %s887_s6, %s888_s10  }
 0x246 PF: > { %p724_p7 = scmp.ge.s32.totalorder %s880_s21, 2  ;;  %s541_s12 = sand.u32 1, %s868_s18  }
 0x247   : > { %s542_s14 = scalar_lea.sflag [#allocation3], %s541_s12 }
 0x248   : > { %p718_p8 = pnand %p724_p7, %p961_p6 }
 0x24a   : > { %859 = dma.done.wait (!%p718_p8), %s542_s14, 512  }
 0x24b   : > { %861 = vsyncadd (!%p718_p8), %s542_s14, 4294966784  ;;  %s551_s15 = scalar_lea.sflag [#allocation5], %s541_s12 }
 0x24c   : > { %863 = dma.done.wait (!%p718_p8), %s551_s15, 256  }
 0x24d   : > { %865 = vsyncadd (!%p718_p8), %s551_s15, 4294967040  ;;  %p19_p5 = scmp.ge.s32.totalorder %s944_s24, 4   ;;  %s1173_s18 = smov %s872_s19 }
 0x24e   : > { %s1174_s19 = smov %s876_s20  ;;  %s1175_s20 = smov %s955_s27 }
 0x24f   : > { %s1176_s21 = smov %s944_s24  ;;  %21 = sbr.rel (!%p19_p5) target bundleno = 5 (0x5), region = 88 }
 0x256   :  { %556 = vsyncpa [#allocation3], 1 }
 0x257   :  { %558 = vsyncpa [#allocation3 + $0x1], 1 }
 0x258   :  { %559 = vsyncpa [#allocation5], 1 }
 0x259   :  { %561 = vsyncpa [#allocation5 + $0x1], 1 }

</bundles_post_ra>
